<compile_context>
chip_gen: v6e
topology: v6e:2x2x1
jax: 0.10.0
libtpu: 0.0.40
codegen_flags: <defaults>
</compile_context>

<pallas_src>
import jax
import jax.numpy as jnp
from jax.experimental import pallas as pl
from jax.experimental.pallas import tpu as pltpu


def _kernel(a_ref, w1_ref, b1_ref, weff_ref, bcls_ref, out_ref):
    # a_ref   : (1, 2*C*KH, Mp)   block-diag im2col for one sample (lane-dense)
    # w1_ref  : (O, 2*C*KH)       [w1_time | w1_freq]
    # b1_ref  : (O, Mp)           per-column conv1 bias map (0 in lane padding)
    # weff_ref: (2, O, Mp)        conv2+classifier folded weights (0 in padding)
    # bcls_ref: (2, 1)            folded classifier bias
    # out_ref : (1, 2, 1)
    a = a_ref[0]                                                    # (2CKH, Mp)
    # conv1 for both branches as a single MXU matmul.
    y = jnp.dot(w1_ref[...], a, preferred_element_type=jnp.float32)  # (O, Mp)
    y = jnp.maximum(y + b1_ref[...], 0.0)                            # bias+ReLU
    # Fused classifier: both output classes in one multiply + reduce pass.
    prod = weff_ref[...] * y[None, :, :]                             # (2, O, Mp)
    s = jnp.sum(prod, axis=2)                                        # lane reduce -> (2, O)
    s = jnp.sum(s, axis=1, keepdims=True)                            # sublane reduce -> (2, 1)
    out_ref[...] = (s + bcls_ref[...])[None, :, :]                   # (1, 2, 1)


def custom_net_forward(x, params, *, nbins):
    """Pallas implementation of customNet.forward (eval mode)."""
    B, C, H, Wtot = x.shape
    WT = Wtot - nbins
    w1t, b1t, w2t, b2t, w1f, b1f, w2f, b2f, wl, bl = params

    O, _, KH, _ = w1t.shape
    KWt = w2t.shape[3]
    KWf = w2f.shape[3]
    H1 = H - KH + 1
    WoT = WT - KWt + 1
    WoF = nbins - KWf + 1
    Mt, Mf = H1 * WT, H1 * nbins
    CKH = C * KH
    time_lin = O * H1 * WoT

    x = x.astype(jnp.float32)
    xt = x[..., :WT]              # time branch input
    xf = x[..., WT:]              # freq branch input (last nbins)

    # ---- im2col for conv1 (kernel (KH,1)) done in the wrapper --------------
    def im2col(xb, W):
        cols = [xb[:, c, kh:kh + H1, :] for c in range(C) for kh in range(KH)]
        return jnp.stack(cols, axis=1).reshape(B, CKH, H1 * W)   # (B, CKH, H1*W)

    At = im2col(xt, WT)           # (B, CKH, Mt)
    Af = im2col(xf, nbins)        # (B, CKH, Mf)

    Mtot = Mt + Mf
    Mp = ((Mtot + 127) // 128) * 128      # lane-dense, 128-aligned
    A = jnp.zeros((B, 2 * CKH, Mp), jnp.float32)
    A = A.at[:, :CKH, :Mt].set(At)        # time columns use rows [0, CKH)
    A = A.at[:, CKH:, Mt:Mtot].set(Af)    # freq columns use rows [CKH, 2CKH)

    # Conv1 weights, concatenated along the contraction dim (block structure).
    W1 = jnp.concatenate([w1t[..., 0].reshape(O, CKH),
                          w1f[..., 0].reshape(O, CKH)], axis=1)   # (O, 2CKH)

    # Per-column conv1 bias map (branch-dependent), zero in lane padding.
    B1 = jnp.concatenate(
        [jnp.broadcast_to(b1t[:, None], (O, Mt)),
         jnp.broadcast_to(b1f[:, None], (O, Mf)),
         jnp.zeros((O, Mp - Mtot), jnp.float32)], axis=1)         # (O, Mp)

    # ---- fold conv2 (1,KW) + Flatten + Linear into effective weights -------
    wl_t = wl[:, :time_lin].reshape(2, O, H1, WoT)   # matches Flatten C-order
    wl_f = wl[:, time_lin:].reshape(2, O, H1, WoF)
    w2t_k = w2t[:, :, 0, :]                          # (O, O, KWt)
    w2f_k = w2f[:, :, 0, :]

    def fold(wl_b, w2_k, KW, Wo, W):
        # Weff[k, i, h1, w] = sum_{o,kw} wl_b[k,o,h1,w-kw] * w2[o,i,kw]
        we = jnp.zeros((2, O, H1, W), jnp.float32)
        for kw in range(KW):
            we = we.at[:, :, :, kw:kw + Wo].add(
                jnp.einsum('kohw,oi->kihw', wl_b, w2_k[:, :, kw]))
        return we.reshape(2, O, H1 * W)

    Weff = jnp.concatenate(
        [fold(wl_t, w2t_k, KWt, WoT, WT),
         fold(wl_f, w2f_k, KWf, WoF, nbins),
         jnp.zeros((2, O, Mp - Mtot), jnp.float32)], axis=2)      # (2, O, Mp)

    bcls = (bl
            + jnp.einsum('kohw,o->k', wl_t, b2t)
            + jnp.einsum('kohw,o->k', wl_f, b2f))[:, None]        # (2, 1)

    # ---- fused kernel: one grid step per batch sample (parallel) -----------
    out = pl.pallas_call(
        _kernel,
        out_shape=jax.ShapeDtypeStruct((B, 2, 1), jnp.float32),
        grid_spec=pltpu.PrefetchScalarGridSpec(
            num_scalar_prefetch=0,
            grid=(B,),
            in_specs=[
                pl.BlockSpec((1, 2 * CKH, Mp), lambda b: (b, 0, 0)),
                pl.BlockSpec((O, 2 * CKH), lambda b: (0, 0)),
                pl.BlockSpec((O, Mp), lambda b: (0, 0)),
                pl.BlockSpec((2, O, Mp), lambda b: (0, 0, 0)),
                pl.BlockSpec((2, 1), lambda b: (0, 0)),
            ],
            out_specs=pl.BlockSpec((1, 2, 1), lambda b: (b, 0, 0)),
        ),
        compiler_params=pltpu.CompilerParams(
            dimension_semantics=("parallel",),
            vmem_limit_bytes=32 * 1024 * 1024,
        ),
    )(A, W1, B1, Weff, bcls)
    return out[:, :, 0]


def init_params(key, *, C, nchan, H, WT, nbins, timefilter, freqfilter):
    """Deterministic PyTorch-shaped parameters (uniform(-1/sqrt(fan_in), ...))."""
    keys = jax.random.split(key, 10)

    def u(k, shape, fan_in):
        b = 1.0 / float(fan_in) ** 0.5
        return jax.random.uniform(k, shape, jnp.float32, -b, b)

    w1t = u(keys[0], (nchan, C, nchan, 1), C * nchan)
    b1t = u(keys[1], (nchan,), C * nchan)
    w2t = u(keys[2], (nchan, nchan, 1, timefilter), nchan * timefilter)
    b2t = u(keys[3], (nchan,), nchan * timefilter)
    w1f = u(keys[4], (nchan, C, nchan, 1), C * nchan)
    b1f = u(keys[5], (nchan,), C * nchan)
    w2f = u(keys[6], (nchan, nchan, 1, freqfilter), nchan * freqfilter)
    b2f = u(keys[7], (nchan,), nchan * freqfilter)

    H1 = H - nchan + 1
    time_lin = nchan * H1 * (WT - timefilter + 1)
    freq_lin = nchan * H1 * (nbins - freqfilter + 1)
    wl = u(keys[8], (2, time_lin + freq_lin), time_lin + freq_lin)
    bl = u(keys[9], (2,), time_lin + freq_lin)
    return (w1t, b1t, w2t, b2t, w1f, b1f, w2f, b2f, wl, bl)


def reference_forward(x, params, *, nbins):
    """Pure-JAX reference mirroring the PyTorch forward (eval mode)."""
    w1t, b1t, w2t, b2t, w1f, b1f, w2f, b2f, wl, bl = params
    xt = x[:, :, :, :-nbins]
    xf = x[:, :, :, -nbins:]

    def conv(inp, w, b):
        y = jax.lax.conv_general_dilated(
            inp, w, (1, 1), 'VALID',
            dimension_numbers=('NCHW', 'OIHW', 'NCHW'),
            precision=jax.lax.Precision.HIGHEST)
        return y + b[None, :, None, None]

    a = conv(xt, w1t, b1t)
    a = jnp.maximum(a, 0.0)
    a = conv(a, w2t, b2t).reshape(x.shape[0], -1)

    f = conv(xf, w1f, b1f)
    f = jnp.maximum(f, 0.0)
    f = conv(f, w2f, b2f).reshape(x.shape[0], -1)

    feat = jnp.concatenate([a, f], axis=1)
    return feat @ wl.T + bl[None, :]


if __name__ == "__main__":
    # Small shapes consistent with the module:
    #   freq_input_size = (C, H, nbins), time_input_size = (C, H, WT)
    #   x : (B, C, H, WT + nbins)
    B, C, H = 2, 2, 8
    WT, NBINS = 16, 16
    NCHAN, TIMEFILTER, FREQFILTER = 5, 7, 7

    key = jax.random.PRNGKey(0)
    kx, kp = jax.random.split(key)
    x = jax.random.normal(kx, (B, C, H, WT + NBINS), jnp.float32)
    params = init_params(kp, C=C, nchan=NCHAN, H=H, WT=WT, nbins=NBINS,
                         timefilter=TIMEFILTER, freqfilter=FREQFILTER)

    out = custom_net_forward(x, params, nbins=NBINS)
    out = jax.block_until_ready(out)

    ref = reference_forward(x, params, nbins=NBINS)
    assert out.shape == (B, 2), out.shape
    assert jnp.allclose(out, ref, rtol=2e-3, atol=2e-3), (out, ref)

    print("KERNEL_OK")
</pallas_src>

<mosaic_0001>
module attributes {stable_mosaic.version = 11 : i64} {
  func.func @_kernel(%arg0: i32, %arg1: memref<1x20x128xf32, #tpu.memory_space<vmem>>, %arg2: memref<5x20xf32, #tpu.memory_space<vmem>>, %arg3: memref<5x128xf32, #tpu.memory_space<vmem>>, %arg4: memref<2x5x128xf32, #tpu.memory_space<vmem>>, %arg5: memref<2x1xf32, #tpu.memory_space<vmem>>, %arg6: memref<1x2x1xf32, #tpu.memory_space<vmem>>) attributes {dimension_semantics = [#tpu.dimension_semantics<parallel>], iteration_bounds = array<i64: 2>, scalar_prefetch = 0 : i64, scratch_operands = 0 : i64, tpu.core_type = #tpu.core_type<tc>, window_params = [{transform_indices = @transform_0, window_bounds = array<i64: 1, 20, 128>}, {pipeline_mode = #tpu.pipeline_mode<synchronous>, transform_indices = @transform_1, window_bounds = array<i64: 5, 20>}, {pipeline_mode = #tpu.pipeline_mode<synchronous>, transform_indices = @transform_2, window_bounds = array<i64: 5, 128>}, {pipeline_mode = #tpu.pipeline_mode<synchronous>, transform_indices = @transform_3, window_bounds = array<i64: 2, 5, 128>}, {pipeline_mode = #tpu.pipeline_mode<synchronous>, transform_indices = @transform_4, window_bounds = array<i64: 2, 1>}, {transform_indices = @transform_5, window_bounds = array<i64: 1, 2, 1>}]} {
    %c0 = arith.constant 0 : index
    %c0_0 = arith.constant 0 : index
    %c0_1 = arith.constant 0 : index
    %0 = vector.load %arg1[%c0, %c0_0, %c0_1] : memref<1x20x128xf32, #tpu.memory_space<vmem>>, vector<1x20x128xf32>
    %1 = vector.shape_cast %0 : vector<1x20x128xf32> to vector<20x128xf32>
    %c0_2 = arith.constant 0 : index
    %c0_3 = arith.constant 0 : index
    %2 = vector.load %arg2[%c0_2, %c0_3] : memref<5x20xf32, #tpu.memory_space<vmem>>, vector<5x20xf32>
    %cst = arith.constant dense<0.000000e+00> : vector<5x128xf32>
    %3 = tpu.matmul %2, %1, %cst {dimension_numbers = #tpu.dot_dimension_numbers<[1], [0], [0], [1], [0, 0, 1, 1], [], []>} : vector<5x20xf32>, vector<20x128xf32>, vector<5x128xf32> -> vector<5x128xf32>
    %c0_4 = arith.constant 0 : index
    %c0_5 = arith.constant 0 : index
    %4 = vector.load %arg3[%c0_4, %c0_5] : memref<5x128xf32, #tpu.memory_space<vmem>>, vector<5x128xf32>
    %5 = arith.addf %3, %4 : vector<5x128xf32>
    %cst_6 = arith.constant 0.000000e+00 : f32
    %6 = vector.broadcast %cst_6 : f32 to vector<5x128xf32>
    %7 = arith.maximumf %5, %6 : vector<5x128xf32>
    %c0_7 = arith.constant 0 : index
    %c0_8 = arith.constant 0 : index
    %c0_9 = arith.constant 0 : index
    %8 = vector.load %arg4[%c0_7, %c0_8, %c0_9] : memref<2x5x128xf32, #tpu.memory_space<vmem>>, vector<2x5x128xf32>
    %9 = vector.shape_cast %7 : vector<5x128xf32> to vector<1x5x128xf32>
    %10 = vector.broadcast %9 : vector<1x5x128xf32> to vector<2x5x128xf32>
    %11 = arith.mulf %8, %10 : vector<2x5x128xf32>
    %cst_10 = arith.constant dense<0.000000e+00> : vector<2x5xf32>
    %12 = vector.multi_reduction <add>, %11, %cst_10 [2] : vector<2x5x128xf32> to vector<2x5xf32>
    %cst_11 = arith.constant dense<0.000000e+00> : vector<2xf32>
    %13 = vector.multi_reduction <add>, %12, %cst_11 [1] : vector<2x5xf32> to vector<2xf32>
    %14 = vector.shape_cast %13 : vector<2xf32> to vector<2x1xf32>
    %c0_12 = arith.constant 0 : index
    %c0_13 = arith.constant 0 : index
    %15 = vector.load %arg5[%c0_12, %c0_13] : memref<2x1xf32, #tpu.memory_space<vmem>>, vector<2x1xf32>
    %16 = arith.addf %14, %15 : vector<2x1xf32>
    %17 = vector.shape_cast %16 : vector<2x1xf32> to vector<1x2x1xf32>
    %c0_14 = arith.constant 0 : index
    %c0_15 = arith.constant 0 : index
    %c0_16 = arith.constant 0 : index
    %18 = vector.load %arg6[%c0_14, %c0_15, %c0_16] : memref<1x2x1xf32, #tpu.memory_space<vmem>>, vector<1x2x1xf32>
    tpu.vector_store %arg6[%c0_14, %c0_15, %c0_16], %17 {strides = array<i32>} : memref<1x2x1xf32, #tpu.memory_space<vmem>>, vector<1x2x1xf32>,
    return
  }
  func.func @transform_0(%arg0: i32) -> (i32, i32, i32) {
    %c0_i32 = arith.constant 0 : i32
    %c0_i32_0 = arith.constant 0 : i32
    %c0_i32_1 = arith.constant 0 : i32
    return %arg0, %c0_i32, %c0_i32_0 : i32, i32, i32
  }
  func.func @transform_1(%arg0: i32) -> (i32, i32) {
    %c0_i32 = arith.constant 0 : i32
    %c0_i32_0 = arith.constant 0 : i32
    %c0_i32_1 = arith.constant 0 : i32
    return %c0_i32, %c0_i32_0 : i32, i32
  }
  func.func @transform_2(%arg0: i32) -> (i32, i32) {
    %c0_i32 = arith.constant 0 : i32
    %c0_i32_0 = arith.constant 0 : i32
    %c0_i32_1 = arith.constant 0 : i32
    return %c0_i32, %c0_i32_0 : i32, i32
  }
  func.func @transform_3(%arg0: i32) -> (i32, i32, i32) {
    %c0_i32 = arith.constant 0 : i32
    %c0_i32_0 = arith.constant 0 : i32
    %c0_i32_1 = arith.constant 0 : i32
    %c0_i32_2 = arith.constant 0 : i32
    return %c0_i32, %c0_i32_0, %c0_i32_1 : i32, i32, i32
  }
  func.func @transform_4(%arg0: i32) -> (i32, i32) {
    %c0_i32 = arith.constant 0 : i32
    %c0_i32_0 = arith.constant 0 : i32
    %c0_i32_1 = arith.constant 0 : i32
    return %c0_i32, %c0_i32_0 : i32, i32
  }
  func.func @transform_5(%arg0: i32) -> (i32, i32, i32) {
    %c0_i32 = arith.constant 0 : i32
    %c0_i32_0 = arith.constant 0 : i32
    %c0_i32_1 = arith.constant 0 : i32
    return %arg0, %c0_i32, %c0_i32_0 : i32, i32, i32
  }
}

</mosaic_0001>

<bundles_post_ra>
// kernel: tpu_custom_call.1
= control target key start
LH: loop header
LB: loop body
LE: loop exit
PB: predicated region body
PF: predicated region fallthrough
CT: control target
= control target key end

     0   :  { %s469_s18 = smov 0   ;;  %s505_s0 = inlined_call_operand.vmem [shape: f32[2,20,128], index: 0, kind: input, shape index: {}]   ;;  %s506_s1 = inlined_call_operand.vmem [shape: f32[5,20], index: 1, kind: input, shape index: {}]   ;;  %s507_s2 = inlined_call_operand.vmem [shape: f32[5,128], index: 2, kind: input, shape index: {}]   ;;  %s508_s3 = inlined_call_operand.vmem [shape: f32[2,5,128], index: 3, kind: input, shape index: {}]   ;;  %s509_s4 = inlined_call_operand.vmem [shape: f32[2,1], index: 4, kind: input, shape index: {}]   ;;  %s510_s5 = inlined_call_operand.vmem [shape: f32[2,2,1], index: 5, kind: output, shape index: {}]  }
   0x1 LB: > { %s394_s19 = sadd.s32 4294967295, %s435_s18   ;;  %p398_p0 = scmp.ge.s32.totalorder %s435_s18, 1  ;;  %s435_s18 = sphi %s469_s18, %s15_s18  }
   0x2   : > { %p187_p1 = scmp.lt.s32.totalorder %s435_s18, 3 }
   0x4   : > { %p188_p2 = pnand %p398_p0, %p187_p1 }
   0x5   : > { %p214_p3 = scmp.lt.s32.totalorder (!%p188_p2), %s394_s19, 1 }
   0x6   : > { %191 = sbr.rel (%p188_p2) target bundleno = 508 (0x1fc), region = 40 }
   0xb   : > { %v437_v0 = vmov 0.0   ;;  %vm438_vm0 = vmmov 0   ;;  %s512_s19 = smov (!%p214_p3, %s394_s19), 1  ;;  %vm232_vm1 = vcmask 1043456   ;;  %v226_v4 = vld [vmem:[%s506_s1] sm:$0x1f]  ;;  %v320_v16 = vlaneseq }
   0xc   : > { %409 = vmatprep.subr.mxu0 %v437_v0  ;;  %415 = vmatprep.mubr.msk.f32.mxu0 %vm438_vm0, %v437_v0  ;;  %s418_s20 = smul.u32 24, %s512_s19  ;;  %vm228_vm2 = vcmask 162816   ;;  %v227_v5 = vld [vmem:[%s507_s2] sm:$0x1f]  ;;  %vm311_vm3 = vcmask 1044480   ;;  %vm330_vm4 = vcmask 1041409  }
   0xd   : > { %v307_v9 = vld [vmem:[%s508_s3] sm:$0x1f]  ;;  %v308_v11 = vld [vmem:[%s508_s3 + $0x8] sm:$0x1f]  ;;  %v321_v17 = vand.u32 127, %v320_v16  ;;  %v323_v18 = vshrl.u32 %v320_v16, 7 }
   0xe   : > { %s218_s23 = scalar_lea.vmem %s505_s0, %s418_s20  ;;  %vm333_vm5 = vcmask 33792   ;;  %s400_s7 = sshll.u32 %s512_s19, 1  ;;  %v337_v26 = vld [vmem:[%s509_s4] sm:$0x3]  ;;  %vm339_vm6 = vcmask 1024  }
   0xf   : > { %v225_v1 = vld [vmem:[%s218_s23 + $0x10] sm:$0xf]  ;;  %v224_v2 = vld [vmem:[%s218_s23 + $0x8] sm:$0xff]  ;;  %v223_v3 = vld [vmem:[%s218_s23] sm:$0xff]  ;;  %v324_v20 = vsub.s32 %v321_v17, %v323_v18  ;;  %s222_s12 = scalar_lea.vmem %s510_s5, %s400_s7 }
  0x10   : > { %410 = vmatpush3.msk.msra.mxu0 %vm232_vm1, %v225_v1 }
  0x11   : > { %411 = vmatprep.subr.mxu0 %v437_v0 }
  0x12   : > { %412 = vmatpush3.msra.mxu0 %v224_v2 }
  0x13   : > { %413 = vmatprep.subr.mxu0 %v437_v0 }
  0x14   : > { %414 = vmatpush3.msra.mxu0 %v223_v3 }
  0x15   : > { %416 = vmatmul.mubr.msk.f32.vlgmr.msra.gmra.mxu0 %vm228_vm2, %v226_v4 }
  0xd5   : > { %v302_v6 = vpop.f32.mrf.mxu0 }
  0xd6   : > { %v303_v7 = vadd.f32 %v302_v6, %v227_v5 }
  0xd7   : > { %v417_v8 = vpop.f32.mrf.mxu0 }
  0xd8   : > { %v306_v10 = vmax.f32 %v303_v7, 0.0 }
  0xda   : > { %v309_v12 = vmul.f32 %v307_v9, %v306_v10  ;;  %v310_v14 = vmul.f32 %v308_v11, %v306_v10 }
  0xdc   : > { %v312_v13 = vsel %vm311_vm3, %v309_v12, 0.0  ;;  %v315_v15 = vsel %vm311_vm3, %v310_v14, 0.0 }
  0xdd   : > { %313 = vadd.xlane.f32.xlu0 %v312_v13 }
  0xe1   : > { %316 = vadd.xlane.f32.xlu0 %v315_v15 }
 0x166   : > { %v314_v19 = vpop.xlane.xlu0 %313 }
 0x167   : > { %v325_v22 = vrot.slane %v314_v19, %v324_v20 }
 0x16a   : > { %v317_v21 = vpop.xlane.xlu0 %316 }
 0x16b   : > { %v329_v23 = vrot.slane %v317_v21, %v324_v20 }
 0x16d   : > { %v331_v24 = vsel %vm330_vm4, %v329_v23, %v325_v22 }
 0x16e   : > { %v334_v25 = vsel %vm333_vm5, %v331_v24, 0.0 }
 0x16f   : > { %335 = vadd.xlane.f32.xlu1 %v334_v25 }
 0x1f8   : > { %v336_v27 = vpop.xlane.xlu1 %335 }
 0x1f9   : > { %v338_v28 = vadd.f32 %v337_v26, %v336_v27 }
 0x1fb   : > { %340 = vst.msk [vmem:[%s222_s12] sm:$0x3] %vm339_vm6, %v338_v28 }
 0x1fc PF: > { %s15_s18 = sadd.s32 1, %s435_s18  }
 0x1fd   : > { %p12_p4 = scmp.ge.s32.totalorder %s15_s18, 4  }
 0x1ff   :  { %14 = sbr.rel (!%p12_p4) target bundleno = 1 (0x1), region = 70 }

</bundles_post_ra>
